<compile_context>
chip_gen: v6e
topology: v6e:2x2x1
jax: 0.10.0
libtpu: 0.0.40
codegen_flags: <defaults>
</compile_context>

<pallas_src>
import functools

import jax
import jax.numpy as jnp
from jax.experimental import pallas as pl
from jax.experimental.pallas import tpu as pltpu


def get_quantized_range(bitwidth):
    quantized_max = (1 << (bitwidth - 1)) - 1
    quantized_min = -(1 << (bitwidth - 1))
    return quantized_min, quantized_max


def _round_up(x, m):
    return (x + m - 1) // m * m


@functools.lru_cache(maxsize=None)
def _use_int_mxu():
    """True when the local MXU has a native int8 -> int32 path (v5e/v5p/v6e)."""
    try:
        kind = jax.devices()[0].device_kind.lower()
    except Exception:
        return False
    return ("v5" in kind) or ("v6" in kind)


def _qlinear_kernel(x_ref, wt_ref, b_ref, o_ref, acc_ref, *,
                    out_scale, qmin, qmax, use_int_mxu):
    # x_ref  : (tm, tk) int8
    # wt_ref : (tk, tn) int8   (weight pre-transposed to (F_in, F_out))
    # b_ref  : (1, tn)  int32  (bias already multiplied by 1 << bias_shift)
    # o_ref  : (tm, tn) int8
    # acc_ref: (tm, tn) int32 VMEM scratch, resident across the K grid axis
    k = pl.program_id(2)

    @pl.when(k == 0)
    def _init():
        # Fold the pre-shifted bias into the accumulator init (free vs epilogue).
        acc_ref[...] = jnp.broadcast_to(b_ref[...], acc_ref.shape)

    if use_int_mxu:
        # v5e / v6e: native int8 x int8 -> int32 MXU accumulation (exact).
        acc_ref[...] += jnp.dot(x_ref[...], wt_ref[...],
                                preferred_element_type=jnp.int32)
    else:
        # v7x / others: cast the int8 tiles to bf16 just before the MXU (cheap
        # VPU work hidden under MXU/DMA) and re-accumulate each K-tile partial
        # in int32.  With tk <= 1024 the f32 partial magnitude is <= 2^24, so
        # the partial (and its int32 cast) is bit-exact for any F_in.
        part = jnp.dot(x_ref[...].astype(jnp.bfloat16),
                       wt_ref[...].astype(jnp.bfloat16),
                       preferred_element_type=jnp.float32)
        acc_ref[...] += part.astype(jnp.int32)

    @pl.when(k == pl.num_programs(2) - 1)
    def _epilogue():
        y = acc_ref[...].astype(jnp.float32) * jnp.float32(out_scale)
        y = jnp.round(y)                              # half-to-even == torch.round
        y = jnp.clip(y, float(qmin), float(qmax))
        o_ref[...] = y.astype(jnp.int8)               # lane-dense int8 store


def prepare_qlinear_params(weight, bias, *, input_n_frac, output_n_frac,
                           weight_n_frac, bias_n_frac, feature_bitwidth=8,
                           weight_bitwidth=8):
    """One-time (model-load) prep: pad + transpose the int8 weight, pre-shift bias."""
    f_out, f_in = weight.shape
    shift_b = input_n_frac + weight_n_frac - bias_n_frac
    shift_o = input_n_frac + weight_n_frac - output_n_frac
    assert 0 <= shift_b < 31 and 0 <= shift_o < 63, "bad fixed-point shift"

    tk = min(1024, _round_up(f_in, 128))   # K tile; <=1024 keeps bf16 path exact
    tn = min(512, _round_up(f_out, 128))   # lane-dense output tile
    k_pad = _round_up(f_in, tk)
    n_pad = _round_up(f_out, tn)

    # int8 end-to-end in HBM/VMEM (halves HBM bytes + VMEM footprint vs bf16).
    # TODO(synk): for very large layers on v6e, make the whole int8 weight
    # VMEM-resident (full K x N block, grid over M only) when it fits the budget.
    wt_p = jnp.zeros((k_pad, n_pad), jnp.int8).at[:f_in, :f_out].set(
        weight.astype(jnp.int8).T)
    b_p = jnp.zeros((1, n_pad), jnp.int32).at[0, :f_out].set(
        bias.astype(jnp.int32) * jnp.int32(1 << shift_b))

    qmin, qmax = get_quantized_range(feature_bitwidth)
    return dict(wt_p=wt_p, b_p=b_p, f_in=f_in, f_out=f_out, tk=tk, tn=tn,
                out_scale=1.0 / (1 << shift_o), qmin=qmin, qmax=qmax)


def qlinear_apply(params, x):
    """Hot path: (optional) pad x, run the tiled kernel, slice padding off."""
    if x.ndim != 2:                                   # torch.flatten(x, 1)
        x = x.reshape(x.shape[0], -1)
    n, f_in = x.shape
    assert f_in == params["f_in"], "F_in mismatch with prepared weight"

    wt_p, b_p = params["wt_p"], params["b_p"]
    k_pad, n_pad = wt_p.shape
    tk, tn = params["tk"], params["tn"]
    f_out = params["f_out"]

    tm = min(512, _round_up(n, 32))                   # 32-row mult: int8 sublanes
    m_pad = _round_up(n, tm)

    # Megacore / v7x 2-TC: guarantee >= 2 steps on the parallel axes when the
    # batch only yields a single M tile (tn stays a multiple of 128).
    if m_pad == tm and n_pad == tn and tn % 256 == 0:
        tn //= 2

    # Skip the activation pad copy entirely when x is already tile-aligned int8.
    if n == m_pad and f_in == k_pad and x.dtype == jnp.int8:
        x_p = x
    else:
        x_p = jnp.zeros((m_pad, k_pad), jnp.int8).at[:n, :f_in].set(
            x.astype(jnp.int8))

    kernel = functools.partial(
        _qlinear_kernel, out_scale=params["out_scale"],
        qmin=params["qmin"], qmax=params["qmax"], use_int_mxu=_use_int_mxu())

    out_p = pl.pallas_call(
        kernel,
        out_shape=jax.ShapeDtypeStruct((m_pad, n_pad), jnp.int8),
        grid_spec=pltpu.PrefetchScalarGridSpec(
            num_scalar_prefetch=0,
            grid=(m_pad // tm, n_pad // tn, k_pad // tk),   # reduction axis last
            in_specs=[
                pl.BlockSpec((tm, tk), lambda i, j, k: (i, k)),
                pl.BlockSpec((tk, tn), lambda i, j, k: (k, j)),
                pl.BlockSpec((1, tn), lambda i, j, k: (0, j)),
            ],
            out_specs=pl.BlockSpec((tm, tn), lambda i, j, k: (i, j)),
            scratch_shapes=[pltpu.VMEM((tm, tn), jnp.int32)],
        ),
        compiler_params=pltpu.CompilerParams(
            dimension_semantics=("parallel", "parallel", "arbitrary"),
            vmem_limit_bytes=32 * 1024 * 1024),
        cost_estimate=pl.CostEstimate(
            flops=2 * m_pad * n_pad * k_pad,
            transcendentals=0,
            bytes_accessed=(m_pad * k_pad + k_pad * n_pad
                            + 4 * n_pad + m_pad * n_pad)),
    )(x_p, wt_p, b_p)

    if m_pad != n or n_pad != f_out:
        out_p = out_p[:n, :f_out]
    return out_p


def qlinear_forward(x, weight, bias, *, input_n_frac, output_n_frac,
                    weight_n_frac, bias_n_frac, feature_bitwidth=8,
                    weight_bitwidth=8):
    """Convenience one-shot wrapper (prep + apply); no host sync here."""
    params = prepare_qlinear_params(
        weight, bias, input_n_frac=input_n_frac, output_n_frac=output_n_frac,
        weight_n_frac=weight_n_frac, bias_n_frac=bias_n_frac,
        feature_bitwidth=feature_bitwidth, weight_bitwidth=weight_bitwidth)
    return qlinear_apply(params, x)


def _reference(x, weight, bias, *, input_n_frac, output_n_frac,
               weight_n_frac, bias_n_frac, feature_bitwidth=8):
    # plain-JAX reference mirroring the PyTorch forward
    if x.ndim != 2:
        x = x.reshape(x.shape[0], -1)
    out = jnp.dot(x.astype(jnp.float32),
                  weight.astype(jnp.float32).T).astype(jnp.int32)
    b = bias.astype(jnp.int32) * (1 << (input_n_frac + weight_n_frac - bias_n_frac))
    out = out + b[None, :]
    out = out.astype(jnp.float32) * (
        1.0 / (1 << (input_n_frac + weight_n_frac - output_n_frac)))
    qmin, qmax = get_quantized_range(feature_bitwidth)
    out = jnp.clip(jnp.round(out), qmin, qmax).astype(jnp.int8)
    return out


if __name__ == "__main__":
    key = jax.random.PRNGKey(0)
    kx, kw, kb = jax.random.split(key, 3)

    # small shapes: batch=2, NCHW input (2, 4, 4, 2) -> flattened F_in=32, F_out=16
    N, C, H, W = 2, 4, 4, 2
    F_IN = C * H * W
    F_OUT = 16

    x = jax.random.randint(kx, (N, C, H, W), -128, 128, dtype=jnp.int32).astype(jnp.int8)
    weight = jax.random.randint(kw, (F_OUT, F_IN), -128, 128, dtype=jnp.int32).astype(jnp.int8)
    bias = jax.random.randint(kb, (F_OUT,), -512, 512, dtype=jnp.int32)

    fracs = dict(input_n_frac=4, output_n_frac=3, weight_n_frac=5, bias_n_frac=7)

    # One-time weight prep (model-load time), then the hot-path apply.
    params = prepare_qlinear_params(weight, bias, **fracs)
    out = qlinear_apply(params, x)
    out = jax.block_until_ready(out)

    ref = _reference(x, weight, bias, **fracs)
    assert out.shape == (N, F_OUT) and out.dtype == jnp.int8
    assert jnp.array_equal(out, ref), "mismatch vs reference"

    print("KERNEL_OK")
</pallas_src>

<mosaic_0001>
module attributes {stable_mosaic.version = 11 : i64} {
  func.func @_qlinear_kernel(%arg0: i32, %arg1: i32, %arg2: i32, %arg3: memref<32x128xi8, #tpu.memory_space<vmem>>, %arg4: memref<128x128xi8, #tpu.memory_space<vmem>>, %arg5: memref<1x128xi32, #tpu.memory_space<vmem>>, %arg6: memref<32x128xi8, #tpu.memory_space<vmem>>, %arg7: memref<32x128xi32, #tpu.memory_space<vmem>>) attributes {dimension_semantics = [#tpu.dimension_semantics<parallel>, #tpu.dimension_semantics<parallel>, #tpu.dimension_semantics<arbitrary>], iteration_bounds = array<i64: 1, 1, 1>, scalar_prefetch = 0 : i64, scratch_operands = 1 : i64, tpu.core_type = #tpu.core_type<tc>, window_params = [{transform_indices = @transform_0, window_bounds = array<i64: 32, 128>}, {transform_indices = @transform_1, window_bounds = array<i64: 128, 128>}, {transform_indices = @transform_2, window_bounds = array<i64: 1, 128>}, {transform_indices = @transform_3, window_bounds = array<i64: 32, 128>}]} {
    %c0_i32 = arith.constant 0 : i32
    %0 = arith.cmpi eq, %arg2, %c0_i32 : i32
    %1 = arith.extui %0 : i1 to i32
    %c0_i32_0 = arith.constant 0 : i32
    %2 = arith.cmpi ne, %1, %c0_i32_0 : i32
    scf.if %2 {
      %c0_10 = arith.constant 0 : index
      %c0_11 = arith.constant 0 : index
      %15 = vector.load %arg5[%c0_10, %c0_11] : memref<1x128xi32, #tpu.memory_space<vmem>>, vector<1x128xi32>
      %16 = vector.shape_cast %15 : vector<1x128xi32> to vector<1x128xi32>
      %17 = vector.broadcast %16 : vector<1x128xi32> to vector<32x128xi32>
      %c0_12 = arith.constant 0 : index
      %c0_13 = arith.constant 0 : index
      %18 = vector.load %arg7[%c0_12, %c0_13] : memref<32x128xi32, #tpu.memory_space<vmem>>, vector<32x128xi32>
      tpu.vector_store %arg7[%c0_12, %c0_13], %17 {strides = array<i32>} : memref<32x128xi32, #tpu.memory_space<vmem>>, vector<32x128xi32>,
    } else {
    }
    %c0 = arith.constant 0 : index
    %c0_1 = arith.constant 0 : index
    %3 = vector.load %arg3[%c0, %c0_1] : memref<32x128xi8, #tpu.memory_space<vmem>>, vector<32x128xi8>
    %4 = arith.sitofp %3 : vector<32x128xi8> to vector<32x128xbf16>
    %c0_2 = arith.constant 0 : index
    %c0_3 = arith.constant 0 : index
    %5 = vector.load %arg4[%c0_2, %c0_3] : memref<128x128xi8, #tpu.memory_space<vmem>>, vector<128x128xi8>
    %6 = arith.sitofp %5 : vector<128x128xi8> to vector<128x128xbf16>
    %cst = arith.constant dense<0.000000e+00> : vector<32x128xf32>
    %7 = tpu.matmul %4, %6, %cst {dimension_numbers = #tpu.dot_dimension_numbers<[1], [0], [0], [1], [0, 0, 1, 1], [], []>} : vector<32x128xbf16>, vector<128x128xbf16>, vector<32x128xf32> -> vector<32x128xf32>
    %c0_4 = arith.constant 0 : index
    %c0_5 = arith.constant 0 : index
    %8 = vector.load %arg7[%c0_4, %c0_5] : memref<32x128xi32, #tpu.memory_space<vmem>>, vector<32x128xi32>
    %9 = arith.fptosi %7 : vector<32x128xf32> to vector<32x128xi32>
    %10 = arith.addi %8, %9 : vector<32x128xi32>
    %c0_6 = arith.constant 0 : index
    %c0_7 = arith.constant 0 : index
    %11 = vector.load %arg7[%c0_6, %c0_7] : memref<32x128xi32, #tpu.memory_space<vmem>>, vector<32x128xi32>
    tpu.vector_store %arg7[%c0_6, %c0_7], %10 {strides = array<i32>} : memref<32x128xi32, #tpu.memory_space<vmem>>, vector<32x128xi32>,
    %c0_i32_8 = arith.constant 0 : i32
    %12 = arith.cmpi eq, %arg2, %c0_i32_8 : i32
    %13 = arith.extui %12 : i1 to i32
    %c0_i32_9 = arith.constant 0 : i32
    %14 = arith.cmpi ne, %13, %c0_i32_9 : i32
    scf.if %14 {
      %c0_10 = arith.constant 0 : index
      %c0_11 = arith.constant 0 : index
      %15 = vector.load %arg7[%c0_10, %c0_11] : memref<32x128xi32, #tpu.memory_space<vmem>>, vector<32x128xi32>
      %16 = arith.sitofp %15 : vector<32x128xi32> to vector<32x128xf32>
      %cst_12 = arith.constant 1.562500e-02 : f32
      %17 = vector.broadcast %cst_12 : f32 to vector<32x128xf32>
      %18 = arith.mulf %16, %17 : vector<32x128xf32>
      %19 = math.roundeven %18 : vector<32x128xf32>
      %cst_13 = arith.constant -1.280000e+02 : f32
      %cst_14 = arith.constant 1.270000e+02 : f32
      %20 = vector.broadcast %cst_13 : f32 to vector<32x128xf32>
      %21 = arith.maximumf %20, %19 : vector<32x128xf32>
      %22 = vector.broadcast %cst_14 : f32 to vector<32x128xf32>
      %23 = arith.minimumf %22, %21 : vector<32x128xf32>
      %24 = arith.fptosi %23 : vector<32x128xf32> to vector<32x128xi8>
      %c0_15 = arith.constant 0 : index
      %c0_16 = arith.constant 0 : index
      %25 = vector.load %arg6[%c0_15, %c0_16] : memref<32x128xi8, #tpu.memory_space<vmem>>, vector<32x128xi8>
      tpu.vector_store %arg6[%c0_15, %c0_16], %24 {strides = array<i32>} : memref<32x128xi8, #tpu.memory_space<vmem>>, vector<32x128xi8>,
    } else {
    }
    return
  }
  func.func @transform_0(%arg0: i32, %arg1: i32, %arg2: i32) -> (i32, i32) {
    %c0_i32 = arith.constant 0 : i32
    return %arg0, %arg2 : i32, i32
  }
  func.func @transform_1(%arg0: i32, %arg1: i32, %arg2: i32) -> (i32, i32) {
    %c0_i32 = arith.constant 0 : i32
    return %arg2, %arg1 : i32, i32
  }
  func.func @transform_2(%arg0: i32, %arg1: i32, %arg2: i32) -> (i32, i32) {
    %c0_i32 = arith.constant 0 : i32
    %c0_i32_0 = arith.constant 0 : i32
    return %c0_i32, %arg1 : i32, i32
  }
  func.func @transform_3(%arg0: i32, %arg1: i32, %arg2: i32) -> (i32, i32) {
    %c0_i32 = arith.constant 0 : i32
    return %arg0, %arg1 : i32, i32
  }
}

</mosaic_0001>

<bundles_post_ra>
// kernel: tpu_custom_call.1
= control target key start
LH: loop header
LB: loop body
LE: loop exit
PB: predicated region body
PF: predicated region fallthrough
CT: control target
= control target key end

     0   :  { %8 = vsyncpa [#allocation4], 0  ;;  %s365_s0 = inlined_call_operand.hbm [shape: s8[32,128], index: 0, kind: input, shape index: {}]   ;;  %s366_s1 = inlined_call_operand.hbm [shape: s8[128,128], index: 1, kind: input, shape index: {}]   ;;  %s367_s2 = inlined_call_operand.vmem [shape: s32[1,128], index: 2, kind: input, shape index: {}]   ;;  %s368_s3 = inlined_call_operand.hbm [shape: s8[32,128], index: 3, kind: output, shape index: {}]  }
   0x1   :  { %9 = vsyncpa [#allocation7], 0 }
   0x2   :  { %10 = vsyncpa [#allocation5], 0  ;;  %s328_s12 = smov [#allocation3]   ;;  %s329_s14 = smov [#allocation6]  }
   0x3   :  { %s17_s13 = sshll.u32 %s328_s12, 4  ;;  %s26_s15 = sshll.u32 %s329_s14, 4  ;;  %s18_s13 = int_to_ptr.vmem [resolvable:$true] %s17_s13  ;;  %s27_s15 = int_to_ptr.vmem [resolvable:$true] %s26_s15 }
   0x4   :  { %s270_s16 = scalar_lea.vmem %s18_s13, 128  ;;  %p275_p1 = scmp.lt.s32.totalorder %s18_s13, %s18_s13 }
   0x5   :  { %p271_p0 = scmp.ne.s32.totalorder %s18_s13, %s270_s16  ;;  %p276_p2 = scmp.lt.s32.totalorder %s270_s16, %s270_s16 }
   0x7   :  { %p277_p3 = por %p276_p2, %p275_p1 }
   0x9   :  { %p278_p4 = pnand %p277_p3, %p271_p0 }
   0xb   :  { %281 = shalt.err (!%p278_p4)
}
   0xc   :  { %20 = dma.hbm_to_vmem [thread:$0]  %s365_s0, 128, %s18_s13, [#allocation4]  }
   0xd   :  { %s290_s19 = scalar_lea.vmem %s27_s15, 512  ;;  %p295_p6 = scmp.lt.s32.totalorder %s27_s15, %s27_s15 }
   0xe   :  { %p291_p5 = scmp.ne.s32.totalorder %s27_s15, %s290_s19  ;;  %p296_p7 = scmp.lt.s32.totalorder %s290_s19, %s290_s19 }
  0x10   :  { %p297_p8 = por %p296_p7, %p295_p6 }
  0x12   :  { %p298_p9 = pnand %p297_p8, %p291_p5 }
  0x14   :  { %301 = shalt.err (!%p298_p9)
}
  0x15   :  { %s330_s20 = smov 128   ;;  %s331_s21 = smov 8  }
  0x16   :  { %32 = dma.hbm_to_vmem [thread:$0]  %s366_s1, 512, %s27_s15, [#allocation7], %s330_s20, %s330_s20, %s331_s21  }
  0x17   :  { %322 = dma.done.wait [#allocation4], 128  }
  0x18   :  { %323 = vsyncadd [#allocation4], 4294967168 }
  0x19   :  { %324 = dma.done.wait [#allocation7], 512  }
  0x1a   :  { %325 = vsyncadd [#allocation7], 4294966784  ;;  %v61_v0 = vld [vmem:[#allocation6 + $0x18] sm:$0xff]  ;;  %v60_v4 = vld [vmem:[#allocation6 + $0x10] sm:$0xff] }
  0x1b   :  { %v68_v1 = vunpack.c.l.s8.bf16 %v61_v0  ;;  %v69_v2 = vunpack.c.h.s8.bf16 %v61_v0  ;;  %v55_v3 = vld [vmem:[#allocation3] sm:$0xff]  ;;  %v67_v6 = vunpack.c.h.s8.bf16 %v60_v4  ;;  %v66_v7 = vunpack.c.l.s8.bf16 %v60_v4  ;;  %v59_v8 = vld [vmem:[#allocation6 + $0x8] sm:$0xff]  ;;  %v58_v11 = vld [vmem:[#allocation6] sm:$0xff] }
  0x1c   :  { %v56_v5 = vunpack.c.l.s8.bf16 %v55_v3  ;;  %v65_v9 = vunpack.c.h.s8.bf16 %v59_v8  ;;  %v64_v10 = vunpack.c.l.s8.bf16 %v59_v8  ;;  %v63_v12 = vunpack.c.h.s8.bf16 %v58_v11  ;;  %v194_v17 = vld [vmem:[%s367_s2] ss:$0 sm:$0xff]  ;;  %s332_s2 = smov [#allocation8]  }
  0x1d   :  { %217 = vmatprep.subr.bf16.mxu0 %v69_v2  ;;  %v62_v13 = vunpack.c.l.s8.bf16 %v58_v11  ;;  %v57_v14 = vunpack.c.h.s8.bf16 %v55_v3  ;;  %s184_s24 = sshll.u32 %s332_s2, 4  ;;  %s185_s24 = int_to_ptr.vmem [resolvable:$true] %s184_s24 }
  0x1e   :  { %218 = vmatpush3.bf16.msra.mxu0 %v69_v2  ;;  %233 = vmatprep.mubr.bf16.mxu0 %v56_v5  ;;  %s302_s25 = scalar_lea.vmem %s185_s24, 128  ;;  %p307_p11 = scmp.lt.s32.totalorder %s185_s24, %s185_s24 }
  0x1f   :  { %219 = vmatprep.subr.bf16.mxu0 %v68_v1  ;;  %p303_p10 = scmp.ne.s32.totalorder %s185_s24, %s302_s25  ;;  %p308_p12 = scmp.lt.s32.totalorder %s302_s25, %s302_s25 }
  0x21   :  { %p309_p13 = por %p308_p12, %p307_p11 }
  0x22   :  { %220 = vmatpush3.bf16.msra.mxu0 %v68_v1 }
  0x23   :  { %221 = vmatprep.subr.bf16.mxu0 %v67_v6  ;;  %p310_p0 = pnand %p309_p13, %p303_p10 }
  0x26   :  { %222 = vmatpush3.bf16.msra.mxu0 %v67_v6 }
  0x27   :  { %223 = vmatprep.subr.bf16.mxu0 %v66_v7 }
  0x2a   :  { %224 = vmatpush3.bf16.msra.mxu0 %v66_v7 }
  0x2b   :  { %225 = vmatprep.subr.bf16.mxu0 %v65_v9 }
  0x2e   :  { %226 = vmatpush3.bf16.msra.mxu0 %v65_v9 }
  0x2f   :  { %227 = vmatprep.subr.bf16.mxu0 %v64_v10 }
  0x32   :  { %228 = vmatpush3.bf16.msra.mxu0 %v64_v10 }
  0x33   :  { %229 = vmatprep.subr.bf16.mxu0 %v63_v12 }
  0x36   :  { %230 = vmatpush3.bf16.msra.mxu0 %v63_v12 }
  0x37   :  { %231 = vmatprep.subr.bf16.mxu0 %v62_v13 }
  0x3a   :  { %232 = vmatpush3.bf16.msra.mxu0 %v62_v13 }
  0x3d   :  { %234 = vmatmul.mubr.bf16.vlgmr.msra.gmra.mxu0 %v57_v14 }
  0xfd   :  { %v235_v15 = vpop.f32.mrf.mxu0 }
  0xfe   :  { %v241_v16 = vtrunc.f32 %v235_v15 }
  0xff   :  { %v104_v18 = vpop.f32.mrf.mxu0 }
 0x100   :  { %v242_v19 = vcvt.f32.s32 %v241_v16  ;;  %v237_v20 = vtrunc.f32 %v104_v18 }
 0x101   :  { %v236_v21 = vpop.f32.mrf.mxu0 }
 0x102   :  { %v129_v22 = vadd.s32 %v242_v19, %v194_v17  ;;  %v238_v23 = vcvt.f32.s32 %v237_v20  ;;  %v243_v24 = vtrunc.f32 %v236_v21 }
 0x103   :  { %v107_v25 = vpop.f32.mrf.mxu0 }
 0x104   :  { %v144_v26 = vcvt.s32.f32 %v129_v22  ;;  %v127_v27 = vadd.s32 %v238_v23, %v194_v17  ;;  %v244_v28 = vcvt.f32.s32 %v243_v24  ;;  %v239_v29 = vtrunc.f32 %v107_v25 }
 0x106   :  { %v142_v30 = vcvt.s32.f32 %v127_v27  ;;  %v130_v31 = vadd.s32 %v244_v28, %v194_v17  ;;  %v240_v32 = vcvt.f32.s32 %v239_v29  ;;  %v148_v33 = vmul.f32 0.015625, %v144_v26 }
 0x108   :  { %v146_v34 = vmul.f32 0.015625, %v142_v30  ;;  %v145_v35 = vcvt.s32.f32 %v130_v31  ;;  %v128_v36 = vadd.s32 %v240_v32, %v194_v17  ;;  %v203_v39 = vclampa-f32 %v148_v33, -128, 127 }
 0x10a   :  { %v149_v37 = vmul.f32 0.015625, %v145_v35  ;;  %v143_v38 = vcvt.s32.f32 %v128_v36  ;;  %v199_v40 = vclampa-f32 %v146_v34, -128, 127  ;;  %v253_v45 = vcvt.f32.s32 %v203_v39 }
 0x10c   :  { %v205_v41 = vclampa-f32 %v149_v37, -128, 127  ;;  %v147_v42 = vmul.f32 0.015625, %v143_v38  ;;  %v247_v46 = vcvt.f32.s32 %v199_v40 }
 0x10e   :  { %v256_v43 = vcvt.f32.s32 %v205_v41  ;;  %v201_v44 = vclampa-f32 %v147_v42, -128, 127 }
 0x110   :  { %v250_v47 = vcvt.f32.s32 %v201_v44  ;;  %v175_v49 = vpack.c.b16 %v256_v43, %v253_v45 }
 0x112   :  { %v174_v48 = vpack.c.b16 %v250_v47, %v247_v46 }
 0x114   :  { %v176_v50 = vpack.c.b8 %v175_v49, %v174_v48 }
 0x116   :  { %177 = vst [vmem:[#allocation8] sm:$0xff] %v176_v50 }
 0x117   :  { %313 = shalt.err (!%p310_p0)
}
 0x118   :  { %187 = dma.vmem_to_hbm [thread:$0]  %s185_s24, 128, %s368_s3, [#allocation5]  }
 0x119   :  { %326 = dma.done.wait [#allocation5], 128  }
 0x11a   :  { %327 = vsyncadd [#allocation5], 4294967168 }
 0x11b   :  { %191 = vsyncpa [#allocation4], 1 }
 0x11c   :  { %192 = vsyncpa [#allocation7], 1 }
 0x11d   :  { %193 = vsyncpa [#allocation5], 1 }

</bundles_post_ra>
